<compile_context>
chip_gen: v5e
topology: v5e:2x2
jax: 0.10.0
libtpu: 0.0.40
codegen_flags: <defaults>
</compile_context>

<pallas_src>
import jax
import jax.numpy as jnp
from jax.experimental import pallas as pl
from jax.experimental.pallas import tpu as pltpu


def _round_up(x, m):
    return ((x + m - 1) // m) * m


# --------------------------------------------------------------------------- #
# Kernels
# --------------------------------------------------------------------------- #
def _ff_kernel_weight_resident(x_ref, w_ref, b_ref, o_ref):
    # grid = (out_tiles, batch_tiles): weight/bias block index is constant
    # across the inner (batch) axis, so the weight tile stays in VMEM.
    x = x_ref[...].astype(jnp.float32)

    # F.normalize(x, p=2, dim=1, eps=1e-12):  x * rsqrt(max(||x||^2, 1e-24))
    sq_norm = jnp.sum(x * x, axis=1, keepdims=True)
    x_dir = x * jax.lax.rsqrt(jnp.maximum(sq_norm, 1e-24))

    # Linear: feed MXU in the weight dtype (bf16 fast path), accumulate in f32.
    y = jnp.dot(x_dir.astype(w_ref.dtype), w_ref[...],
                preferred_element_type=jnp.float32)
    y = jax.nn.sigmoid(y + b_ref[...])

    # Dropout(p=0) is identity.
    # TODO(synk): non-zero dropout would need pltpu.prng_seed/prng_random_bits.
    o_ref[...] = y.astype(o_ref.dtype)


def _ff_kernel_x_resident(x_ref, w_ref, b_ref, o_ref, xdir_ref):
    # grid = (batch_tiles, out_tiles): x block index is constant across the
    # inner (out) axis; normalize once per batch tile into a VMEM scratch and
    # reuse it for every OUT tile (no per-OUT-tile reduce/rsqrt/cast recompute).
    @pl.when(pl.program_id(1) == 0)
    def _():
        x = x_ref[...].astype(jnp.float32)
        sq_norm = jnp.sum(x * x, axis=1, keepdims=True)
        xdir_ref[...] = (x * jax.lax.rsqrt(jnp.maximum(sq_norm, 1e-24))
                         ).astype(xdir_ref.dtype)

    y = jnp.dot(xdir_ref[...], w_ref[...], preferred_element_type=jnp.float32)
    y = jax.nn.sigmoid(y + b_ref[...])
    o_ref[...] = y.astype(o_ref.dtype)


# --------------------------------------------------------------------------- #
# Wrappers
# --------------------------------------------------------------------------- #
def prepare_params(weight, bias, *, block_out_max=512, weight_dtype=jnp.bfloat16):
    """One-time weight preparation (hoist out of the per-call hot path).

    weight: (OUT, IN) as in torch.nn.Linear; bias: (OUT,).
    Returns (w_t, b2d, out_features, block_out) with w_t: (IN, OUT_p) in
    weight_dtype and b2d: (1, OUT_p) f32, OUT_p a lane-dense multiple of 128.
    """
    OUT, IN = weight.shape
    block_out = min(_round_up(OUT, 128), max(128, _round_up(block_out_max, 128)))
    OUT_p = _round_up(OUT, block_out)

    w_t = weight.astype(weight_dtype).T                   # (IN, OUT): kernel does x @ W
    b2d = bias.astype(jnp.float32).reshape(1, OUT)
    if OUT_p != OUT:
        w_t = jnp.pad(w_t, ((0, 0), (0, OUT_p - OUT)))
        b2d = jnp.pad(b2d, ((0, 0), (0, OUT_p - OUT)))
    return w_t, b2d, OUT, block_out


def forward_layer_prepared(x, w_t, b2d, out_features, block_out, *,
                           block_b_max=1024, out_dtype=None):
    """Hot path: x (B, IN) f32, prepared (w_t, b2d) from prepare_params."""
    B, IN = x.shape
    OUT_p = w_t.shape[1]
    w_bytes = jnp.dtype(w_t.dtype).itemsize
    out_dtype = x.dtype if out_dtype is None else out_dtype
    out_bytes = jnp.dtype(out_dtype).itemsize

    # ---- Generation-aware VMEM budget ----
    try:
        vmem_cap = int(pltpu.get_tpu_info().vmem_capacity_bytes)
    except Exception:
        vmem_cap = 64 << 20                      # conservative (v7x) fallback
    vmem_budget = max(32 << 20, int(0.85 * vmem_cap))

    # Double-buffered footprint estimate (+ scratch for the x-resident variant).
    def footprint(bb):
        return (2 * (bb * IN * 4                         # x tile (f32)
                     + IN * block_out * w_bytes          # weight tile
                     + block_out * 4                     # bias tile
                     + bb * block_out * out_bytes)       # output tile
                + bb * IN * w_bytes)                     # x_dir scratch

    # ---- Batch tiling: fit VMEM, near-full last tile, >=2 tiles for megacore ----
    block_b_cap = max(8, _round_up(min(block_b_max, _round_up(B, 8)), 8))
    while block_b_cap > 8 and footprint(block_b_cap) > vmem_budget:
        block_b_cap = max(8, _round_up(block_b_cap // 2, 8))

    n_btiles = max(pl.cdiv(B, block_b_cap), 2 if B >= 16 else 1)
    block_b = _round_up(pl.cdiv(B, n_btiles), 8)
    B_p = _round_up(B, block_b)
    if B_p != B:
        # Zero rows: ||0||^2 -> rsqrt(1e-24) but multiplied by 0 -> no NaN/Inf;
        # padded rows are sliced off below.
        x = jnp.pad(x, ((0, B_p - B), (0, 0)))
    n_btiles = B_p // block_b
    n_otiles = OUT_p // block_out

    vmem_limit = int(min(max(32 << 20, int(1.5 * footprint(block_b))),
                         vmem_budget))

    # ---- Grid ordering: keep the larger operand resident across the inner axis ----
    weight_is_larger = (IN * OUT_p * w_bytes) >= (B_p * IN * 4)

    if weight_is_larger or n_otiles == 1:
        # out outer / batch inner: each weight tile DMA'd once in total;
        # x streams (exactly once when n_otiles == 1).
        grid = (n_otiles, n_btiles)
        in_specs = [
            pl.BlockSpec((block_b, IN), lambda j, i: (i, 0)),
            pl.BlockSpec((IN, block_out), lambda j, i: (0, j)),
            pl.BlockSpec((1, block_out), lambda j, i: (0, j)),
        ]
        out_spec = pl.BlockSpec((block_b, block_out), lambda j, i: (i, j))
        kernel = _ff_kernel_weight_resident
        scratch = []
        dim_sem = ("parallel", "parallel")
    else:
        # batch outer / out inner: x tile + its normalization stay resident in
        # a VMEM scratch across the OUT sweep; only the weight streams.
        grid = (n_btiles, n_otiles)
        in_specs = [
            pl.BlockSpec((block_b, IN), lambda i, j: (i, 0)),
            pl.BlockSpec((IN, block_out), lambda i, j: (0, j)),
            pl.BlockSpec((1, block_out), lambda i, j: (0, j)),
        ]
        out_spec = pl.BlockSpec((block_b, block_out), lambda i, j: (i, j))
        kernel = _ff_kernel_x_resident
        scratch = [pltpu.VMEM((block_b, IN), w_t.dtype)]
        dim_sem = ("parallel", "arbitrary")   # inner axis carries the scratch

    out = pl.pallas_call(
        kernel,
        out_shape=jax.ShapeDtypeStruct((B_p, OUT_p), out_dtype),
        grid_spec=pltpu.PrefetchScalarGridSpec(
            num_scalar_prefetch=0,
            grid=grid,
            in_specs=in_specs,
            out_specs=out_spec,
            scratch_shapes=scratch),
        compiler_params=pltpu.CompilerParams(
            dimension_semantics=dim_sem,
            vmem_limit_bytes=vmem_limit),
    )(x, w_t, b2d)

    return out[:B, :out_features]


def forward_layer(x, weight, bias, *, block_b_max=1024, block_out_max=512,
                  weight_dtype=jnp.bfloat16, out_dtype=None):
    """Convenience wrapper: prepares params each call (hoist prepare_params
    yourself in a training/eval loop)."""
    w_t, b2d, out_features, block_out = prepare_params(
        weight, bias, block_out_max=block_out_max, weight_dtype=weight_dtype)
    return forward_layer_prepared(x, w_t, b2d, out_features, block_out,
                                  block_b_max=block_b_max, out_dtype=out_dtype)


def _reference(x, weight, bias):
    # Pure-JAX reference mirroring the PyTorch forward (f32 throughout).
    norm = jnp.sqrt(jnp.sum(x * x, axis=1, keepdims=True))
    x_dir = x / jnp.maximum(norm, 1e-12)
    return jax.nn.sigmoid(x_dir @ weight.T + bias)


if __name__ == "__main__":
    key = jax.random.PRNGKey(0)

    def make_inputs(k, B, IN, OUT):
        kx, kw, kb = jax.random.split(k, 3)
        x = jax.random.normal(kx, (B, IN), dtype=jnp.float32)
        bound = 1.0 / (IN ** 0.5)
        weight = jax.random.uniform(kw, (OUT, IN), minval=-bound, maxval=bound,
                                    dtype=jnp.float32)
        bias = jax.random.uniform(kb, (OUT,), minval=-bound, maxval=bound,
                                  dtype=jnp.float32)
        return x, weight, bias

    k1, k2 = jax.random.split(key)

    # --- Test 1: module-like shapes (in=32, out=64), bf16 weight fast path,
    #     non-multiple batch to exercise padding, weight-resident grid. ---
    B, IN, OUT = 250, 32, 64
    x, weight, bias = make_inputs(k1, B, IN, OUT)
    ref = _reference(x, weight, bias)

    out = jax.block_until_ready(forward_layer(x, weight, bias))
    assert out.shape == (B, OUT)
    max_err = float(jnp.max(jnp.abs(out - ref)))
    assert max_err < 2e-2, f"bf16-weight path mismatch vs reference: {max_err}"

    # --- Test 2: same shapes, f32 weights (tight tolerance). ---
    out_f32 = jax.block_until_ready(
        forward_layer(x, weight, bias, weight_dtype=jnp.float32))
    assert jnp.allclose(out_f32, ref, atol=1e-5, rtol=1e-5), \
        "f32-weight path mismatch vs reference"

    # --- Test 3: multiple OUT tiles with x larger than the weight, so the
    #     x-resident kernel (hoisted normalization in VMEM scratch) is used. ---
    B, IN, OUT = 512, 32, 384
    x3, weight3, bias3 = make_inputs(k2, B, IN, OUT)
    ref3 = _reference(x3, weight3, bias3)
    out3 = jax.block_until_ready(
        forward_layer(x3, weight3, bias3, weight_dtype=jnp.float32,
                      block_out_max=128))
    assert out3.shape == (B, OUT)
    assert jnp.allclose(out3, ref3, atol=1e-5, rtol=1e-5), \
        "x-resident path mismatch vs reference"

    print("KERNEL_OK")
</pallas_src>

<mosaic_0001>
module attributes {stable_mosaic.version = 11 : i64} {
  func.func @_ff_kernel_weight_resident(%arg0: i32, %arg1: i32, %arg2: memref<128x32xf32, #tpu.memory_space<vmem>>, %arg3: memref<32x128xbf16, #tpu.memory_space<vmem>>, %arg4: memref<1x128xf32, #tpu.memory_space<vmem>>, %arg5: memref<128x128xf32, #tpu.memory_space<vmem>>) attributes {dimension_semantics = [#tpu.dimension_semantics<parallel>, #tpu.dimension_semantics<parallel>], iteration_bounds = array<i64: 1, 2>, scalar_prefetch = 0 : i64, scratch_operands = 0 : i64, tpu.core_type = #tpu.core_type<tc>, window_params = [{transform_indices = @transform_0, window_bounds = array<i64: 128, 32>}, {transform_indices = @transform_1, window_bounds = array<i64: 32, 128>}, {transform_indices = @transform_2, window_bounds = array<i64: 1, 128>}, {transform_indices = @transform_3, window_bounds = array<i64: 128, 128>}]} {
    %c0 = arith.constant 0 : index
    %c0_0 = arith.constant 0 : index
    %0 = vector.load %arg2[%c0, %c0_0] : memref<128x32xf32, #tpu.memory_space<vmem>>, vector<128x32xf32>
    %1 = arith.mulf %0, %0 : vector<128x32xf32>
    %cst = arith.constant dense<0.000000e+00> : vector<128xf32>
    %2 = vector.multi_reduction <add>, %1, %cst [1] : vector<128x32xf32> to vector<128xf32>
    %3 = vector.shape_cast %2 : vector<128xf32> to vector<128x1xf32>
    %cst_1 = arith.constant 1.000000e-24 : f32
    %4 = vector.broadcast %cst_1 : f32 to vector<128x1xf32>
    %5 = arith.maximumf %3, %4 : vector<128x1xf32>
    %6 = math.rsqrt %5 : vector<128x1xf32>
    %7 = vector.broadcast %6 : vector<128x1xf32> to vector<128x32xf32>
    %8 = arith.mulf %0, %7 : vector<128x32xf32>
    %9 = arith.truncf %8 : vector<128x32xf32> to vector<128x32xbf16>
    %c0_2 = arith.constant 0 : index
    %c0_3 = arith.constant 0 : index
    %10 = vector.load %arg3[%c0_2, %c0_3] : memref<32x128xbf16, #tpu.memory_space<vmem>>, vector<32x128xbf16>
    %cst_4 = arith.constant dense<0.000000e+00> : vector<128x128xf32>
    %11 = tpu.matmul %9, %10, %cst_4 {dimension_numbers = #tpu.dot_dimension_numbers<[1], [0], [0], [1], [0, 0, 1, 1], [], []>} : vector<128x32xbf16>, vector<32x128xbf16>, vector<128x128xf32> -> vector<128x128xf32>
    %c0_5 = arith.constant 0 : index
    %c0_6 = arith.constant 0 : index
    %12 = vector.load %arg4[%c0_5, %c0_6] : memref<1x128xf32, #tpu.memory_space<vmem>>, vector<1x128xf32>
    %13 = vector.broadcast %12 : vector<1x128xf32> to vector<128x128xf32>
    %14 = arith.addf %11, %13 : vector<128x128xf32>
    %15 = arith.negf %14 : vector<128x128xf32>
    %16 = math.exp %15 : vector<128x128xf32>
    %cst_7 = arith.constant 1.000000e+00 : f32
    %17 = vector.broadcast %cst_7 : f32 to vector<128x128xf32>
    %18 = arith.addf %17, %16 : vector<128x128xf32>
    %19 = arith.divf %17, %18 : vector<128x128xf32>
    %c0_8 = arith.constant 0 : index
    %c0_9 = arith.constant 0 : index
    %20 = vector.load %arg5[%c0_8, %c0_9] : memref<128x128xf32, #tpu.memory_space<vmem>>, vector<128x128xf32>
    tpu.vector_store %arg5[%c0_8, %c0_9], %19 {strides = array<i32>} : memref<128x128xf32, #tpu.memory_space<vmem>>, vector<128x128xf32>,
    return
  }
  func.func @transform_0(%arg0: i32, %arg1: i32) -> (i32, i32) {
    %c0_i32 = arith.constant 0 : i32
    %c0_i32_0 = arith.constant 0 : i32
    return %arg1, %c0_i32 : i32, i32
  }
  func.func @transform_1(%arg0: i32, %arg1: i32) -> (i32, i32) {
    %c0_i32 = arith.constant 0 : i32
    %c0_i32_0 = arith.constant 0 : i32
    return %c0_i32, %arg0 : i32, i32
  }
  func.func @transform_2(%arg0: i32, %arg1: i32) -> (i32, i32) {
    %c0_i32 = arith.constant 0 : i32
    %c0_i32_0 = arith.constant 0 : i32
    return %c0_i32, %arg0 : i32, i32
  }
  func.func @transform_3(%arg0: i32, %arg1: i32) -> (i32, i32) {
    %c0_i32 = arith.constant 0 : i32
    return %arg1, %arg0 : i32, i32
  }
}

</mosaic_0001>

<bundles_post_ra>
// kernel: tpu_custom_call.1
= control target key start
LH: loop header
LB: loop body
LE: loop exit
PB: predicated region body
PF: predicated region fallthrough
CT: control target
= control target key end

     0   :  { %8 = vsyncpa [#allocation3], 0  ;;  %s2075_s0 = inlined_call_operand.vmem [shape: f32[256,32], index: 0, kind: input, shape index: {}]   ;;  %s2076_s1 = inlined_call_operand.vmem [shape: bf16[32,128], index: 1, kind: input, shape index: {}]   ;;  %s2077_s2 = inlined_call_operand.vmem [shape: f32[1,128], index: 2, kind: input, shape index: {}]   ;;  %s2078_s3 = inlined_call_operand.hbm [shape: f32[256,128], index: 3, kind: output, shape index: {}]  }
   0x1   :  { %10 = vsyncpa [#allocation3 + $0x1], 0  ;;  %s1340_s12 = smov 0   ;;  %s1342_s13 = smov 0  }
   0x2   :  { %s1344_s14 = smov 0   ;;  %s1346_s15 = smov 0  }
   0x3   :  { %s1348_s16 = smov 0   ;;  %s1350_s17 = smov 0  }
   0x4 LB: > { %s1028_s18 = sadd.s32 4294967295, %s1316_s17   ;;  %s1029_s19 = sadd.s32 4294967294, %s1316_s17   ;;  %s1316_s17 = sphi %s1350_s17, %s16_s17   ;;  %s1312_s16 = sphi %s1348_s16, %s2127_s16   ;;  %s1308_s15 = sphi %s1346_s15, %s2126_s15   ;;  %s1304_s14 = sphi %s1344_s14, %s2125_s14   ;;  %s1300_s13 = sphi %s1342_s13, %s2124_s13   ;;  %s1296_s12 = sphi %s1340_s12, %s2123_s12  }
   0x5   : > { %s25_s20 = sadd.s32 1, %s1312_s16  ;;  %s115_s21 = sadd.s32 1, %s1304_s14 }
   0x6   : > { %p26_p0 = scmp.ge.s32.totalorder %s25_s20, 2  ;;  %p125_p1 = scmp.ne.s32.totalorder %s1304_s14, %s1300_s13 }
   0x7   : > { %p126_p2 = scmp.eq.s32.totalorder %s1028_s18, 1  ;;  %p131_p3 = scmp.ne.s32.totalorder %s1300_s13, %s1296_s12 }
   0x8   : > { %s2129_s20 = smov (%p26_p0, %s25_s20), 0  ;;  %p132_p5 = scmp.eq.s32.totalorder %s1029_s19, 1 }
   0x9   : > { %p1380_p4 = por %p126_p2, %p125_p1  ;;  %s110_s23 = ssub.s32 %s1312_s16, %s2129_s20 }
   0xa   : > { %p1034_p6 = scmp.ge.s32.totalorder %s1316_s17, 1  ;;  %p113_p7 = scmp.eq.s32.totalorder %s110_s23, 0 }
   0xb   : > { %p1387_p8 = por %p132_p5, %p131_p3  ;;  %p172_p9 = scmp.lt.s32.totalorder %s1316_s17, 3 }
   0xc   : > { %s1393_s25 = scalar_select %p113_p7, %s1304_s14, %s115_s21  }
   0xd   : > { %p173_p10 = pnand %p1034_p6, %p172_p9 }
   0xe   : > { %s1036_s26 = sshll.u32 (!%p173_p10), %s1308_s15, 4  ;;  %s200_s10 = sand.u32 (!%p173_p10), 1, %s1300_s13  }
   0xf   : > { %176 = sbr.rel (%p173_p10) target bundleno = 397 (0x18d), region = 32  ;;  %p204_p11 = scmp.lt.s32.totalorder (!%p173_p10), %s1036_s26, 31 }
  0x10   : > { %s1838_s11 = sshll.u32 (!%p173_p10), %s200_s10, 7  ;;  %s1077_s19 = sshll.u32 (!%p173_p10), %s1308_s15, 7 }
  0x11   : > { %s1869_s18 = scalar_lea.vmem (!%p173_p10), [#allocation2], %s1838_s11  ;;  %s913_s15 = scalar_lea.sflag (!%p173_p10), [#allocation3], %s200_s10 }
  0x12   : > { %s1258_s6 = scalar_lea.hbm (!%p173_p10), %s2078_s3, 256 }
  0x14   : > { %s2131_s26 = smov (!%p204_p11, %s1036_s26), 31  ;;  %vm250_vm0 = vcmask 261120   ;;  %v1076_v48 = vld [vmem:[%s2076_s1 + $0x8] sm:$0xff]  ;;  %v1075_v54 = vld [vmem:[%s2076_s1] sm:$0xff] }
  0x15   : > { %s1037_s27 = sshll.u32 %s2131_s26, 3  ;;  %549 = vmatpush.bf16.msra.mxu0 %v1076_v48  ;;  %1079 = vmatpush.bf16.msra.mxu2 %v1076_v48  ;;  %s925_s26 = scalar_lea.hbm %s2078_s3, %s1077_s19 }
  0x16   : > { %s1399_s30 = scalar_lea.vmem %s2075_s0, %s1037_s27  ;;  %1080 = vmatpush.bf16.msra.mxu3 %v1076_v48  ;;  %1078 = vmatpush.bf16.msra.mxu1 %v1076_v48  ;;  %s926_s27 = sshll.u32 %s1869_s18, 4  ;;  %s927_s27 = int_to_ptr.vmem [resolvable:$true] %s926_s27 }
  0x17   : > { %v1402_v0 = vld [vmem:[%s1399_s30 + $0x60] sm:$0xff]  ;;  %v1417_v6 = vld [vmem:[%s1399_s30 + $0x68] sm:$0xff]  ;;  %v1444_v20 = vld [vmem:[%s1399_s30 + $0x50] sm:$0xff]  ;;  %s928_s28 = sshll.u32 %s925_s26, 4  ;;  %s929_s28 = int_to_ptr.hbm [resolvable:$true] %s928_s28 }
  0x18   : > { %v1405_v1 = vld [vmem:[%s1399_s30 + $0x40] sm:$0xff]  ;;  %v246_v3 = vmul.f32 %v1402_v0, %v1402_v0  ;;  %v1420_v7 = vld [vmem:[%s1399_s30 + $0x48] sm:$0xff]  ;;  %v247_v12 = vmul.f32 %v1417_v6, %v1417_v6  ;;  %v244_v23 = vmul.f32 %v1444_v20, %v1444_v20  ;;  %v1456_v27 = vld [vmem:[%s1399_s30 + $0x70] sm:$0xff]  ;;  %s1252_s29 = sshra.s32 %s929_s28, 4  ;;  %s1253_s29 = int_to_ptr.hbm [resolvable:$true] %s1252_s29 }
  0x19   : > { %v1408_v2 = vld [vmem:[%s1399_s30] sm:$0xff]  ;;  %v242_v4 = vmul.f32 %v1405_v1, %v1405_v1  ;;  %v1426_v11 = vld [vmem:[%s1399_s30 + $0x8] sm:$0xff]  ;;  %v243_v13 = vmul.f32 %v1420_v7, %v1420_v7  ;;  %v1459_v28 = vld [vmem:[%s1399_s30 + $0x58] sm:$0xff]  ;;  %v248_v30 = vmul.f32 %v1456_v27, %v1456_v27  ;;  %550 = vmatpush.bf16.msra.mxu0 %v1075_v54  ;;  %1082 = vmatpush.bf16.msra.mxu2 %v1075_v54  ;;  %p1259_p1 = scmp.lt.s32.totalorder %s1253_s29, %s2078_s3 }
  0x1a   : > { %v234_v5 = vmul.f32 %v1408_v2, %v1408_v2  ;;  %v287_v8 = vsel %vm250_vm0, %v246_v3, 0.0  ;;  %v235_v14 = vmul.f32 %v1426_v11, %v1426_v11  ;;  %v290_v15 = vsel %vm250_vm0, %v247_v12, 0.0  ;;  %v1438_v18 = vld [vmem:[%s1399_s30 + $0x28] sm:$0xff]  ;;  %v1441_v19 = vld [vmem:[%s1399_s30 + $0x20] sm:$0xff]  ;;  %v1462_v29 = vld [vmem:[%s1399_s30 + $0x78] sm:$0xff]  ;;  %1083 = vmatpush.bf16.msra.mxu3 %v1075_v54  ;;  %1081 = vmatpush.bf16.msra.mxu1 %v1075_v54 }
  0x1b   : > { %v275_v9 = vsel %vm250_vm0, %v242_v4, 0.0  ;;  %288 = vadd.xlane.f32.xlu1 %v287_v8  ;;  %v278_v16 = vsel %vm250_vm0, %v243_v13, 0.0  ;;  %v239_v21 = vmul.f32 %v1438_v18, %v1438_v18  ;;  %v238_v22 = vmul.f32 %v1441_v19, %v1441_v19  ;;  %v1474_v36 = vld [vmem:[%s1399_s30 + $0x18] sm:$0xff]  ;;  %v1477_v37 = vld [vmem:[%s1399_s30 + $0x10] sm:$0xff] }
  0x1c   : > { %v251_v10 = vsel %vm250_vm0, %v234_v5, 0.0  ;;  %276 = vadd.xlane.f32.xlu0 %v275_v9  ;;  %v254_v17 = vsel %vm250_vm0, %v235_v14, 0.0  ;;  %v281_v26 = vsel %vm250_vm0, %v244_v23, 0.0  ;;  %v245_v31 = vmul.f32 %v1459_v28, %v1459_v28  ;;  %v1480_v38 = vld [vmem:[%s1399_s30 + $0x30] sm:$0xff]  ;;  %v1492_v45 = vld [vmem:[%s1399_s30 + $0x38] sm:$0xff]  ;;  %s1254_s30 = scalar_lea.hbm %s1253_s29, 128 }
  0x1d   : > { %252 = vadd.xlane.f32.xlu2 %v251_v10  ;;  %v266_v24 = vsel %vm250_vm0, %v239_v21, 0.0  ;;  %v263_v25 = vsel %vm250_vm0, %v238_v22, 0.0  ;;  %v249_v32 = vmul.f32 %v1462_v29, %v1462_v29  ;;  %v293_v33 = vsel %vm250_vm0, %v248_v30, 0.0  ;;  %p1255_p12 = scmp.ne.s32.totalorder %s1253_s29, %s1254_s30  ;;  %p1260_p2 = scmp.lt.s32.totalorder %s1258_s6, %s1254_s30 }
  0x1e   : > { %v284_v34 = vsel %vm250_vm0, %v245_v31, 0.0  ;;  %v237_v39 = vmul.f32 %v1474_v36, %v1474_v36  ;;  %v236_v40 = vmul.f32 %v1477_v37, %v1477_v37  ;;  %v240_v41 = vmul.f32 %v1480_v38, %v1480_v38 }
  0x1f   : > { %v296_v35 = vsel %vm250_vm0, %v249_v32, 0.0  ;;  %v241_v46 = vmul.f32 %v1492_v45, %v1492_v45  ;;  %p1256_p13 = pnand %p1255_p12, %p1380_p4  ;;  %p1261_p3 = por %p1260_p2, %p1259_p1 }
  0x20   : > { %v260_v42 = vsel %vm250_vm0, %v237_v39, 0.0  ;;  %v257_v43 = vsel %vm250_vm0, %v236_v40, 0.0  ;;  %v269_v44 = vsel %vm250_vm0, %v240_v41, 0.0 }
  0x21   : > { %v272_v47 = vsel %vm250_vm0, %v241_v46, 0.0  ;;  %p1257_p0 = pneg %p1256_p13 }
  0x23   : > { %291 = vadd.xlane.f32.xlu1 %v290_v15  ;;  %p1262_p5 = pnand %p1261_p3, %p1257_p0 }
  0x24   : > { %279 = vadd.xlane.f32.xlu0 %v278_v16 }
  0x25   : > { %255 = vadd.xlane.f32.xlu2 %v254_v17 }
  0x2b   : > { %267 = vadd.xlane.f32.xlu1 %v266_v24 }
  0x2c   : > { %264 = vadd.xlane.f32.xlu0 %v263_v25 }
  0x2d   : > { %282 = vadd.xlane.f32.xlu2 %v281_v26 }
  0x33   : > { %294 = vadd.xlane.f32.xlu1 %v293_v33 }
  0x34   : > { %285 = vadd.xlane.f32.xlu0 %v284_v34 }
  0x35   : > { %297 = vadd.xlane.f32.xlu2 %v296_v35 }
  0x3b   : > { %261 = vadd.xlane.f32.xlu1 %v260_v42 }
  0x3c   : > { %258 = vadd.xlane.f32.xlu0 %v257_v43 }
  0x3d   : > { %270 = vadd.xlane.f32.xlu2 %v269_v44 }
  0x44   : > { %273 = vadd.xlane.f32.xlu0 %v272_v47 }
  0x8e   : > { %v289_v49 = vpop.xlane.xlu1 %288 }
  0x8f   : > { %v277_v50 = vpop.xlane.xlu0 %276  ;;  %v1500_v51 = vmax.f32 %v289_v49, 1e-24 }
  0x90   : > { %v1502_v52 = vmax.f32 %v277_v50, 1e-24  ;;  %v253_v53 = vpop.xlane.xlu2 %252 }
  0x91   : > { %v1507_v55 = vmax.f32 %v253_v53, 1e-24  ;;  %1142 = vrsqrt.f32 %v1500_v51  ;;  %vm441_vm3 = vweird.f32 %v1500_v51 }
  0x92   : > { %1144 = vrsqrt.f32 %v1502_v52  ;;  %vm401_vm1 = vweird.f32 %v1502_v52 }
  0x93   : > { %1146 = vrsqrt.f32 %v1507_v55  ;;  %vm321_vm2 = vweird.f32 %v1507_v55 }
  0x96   : > { %v292_v56 = vpop.xlane.xlu1 %291 }
  0x97   : > { %v280_v57 = vpop.xlane.xlu0 %279  ;;  %v1512_v58 = vpop.eup %1142  ;;  %v1514_v59 = vmax.f32 %v292_v56, 1e-24 }
  0x98   : > { %v1516_v60 = vmax.f32 %v280_v57, 1e-24  ;;  %v256_v61 = vpop.xlane.xlu2 %255  ;;  %v1518_v62 = vpop.eup %1144  ;;  %v436_v63 = vmul.f32 %v1512_v58, %v1500_v51  ;;  %vm442_vm4 = vweird.f32 %v1512_v58 }
  0x99   : > { %v1522_v3 = vmax.f32 %v256_v61, 1e-24  ;;  %v1524_v4 = vpop.eup %1146  ;;  %v396_v5 = vmul.f32 %v1518_v62, %v1502_v52  ;;  %1148 = vrsqrt.f32 %v1514_v59  ;;  %vm402_vm5 = vweird.f32 %v1518_v62 }
  0x9a   : > { %v437_v8 = vmul.f32 %v1512_v58, %v436_v63  ;;  %v316_v9 = vmul.f32 %v1524_v4, %v1507_v55  ;;  %1150 = vrsqrt.f32 %v1516_v60  ;;  %vm322_vm6 = vweird.f32 %v1524_v4  ;;  %vm1580_vm10 = vmor %vm401_vm1, %vm402_vm5 }
  0x9b   : > { %v397_v10 = vmul.f32 %v1518_v62, %v396_v5  ;;  %1152 = vrsqrt.f32 %v1522_v3  ;;  %vm451_vm7 = vweird.f32 %v1514_v59  ;;  %vm411_vm8 = vweird.f32 %v1516_v60  ;;  %vm1601_vm13 = vmor %vm321_vm2, %vm322_vm6 }
  0x9c   : > { %v317_v12 = vmul.f32 %v1524_v4, %v316_v9  ;;  %v438_v14 = vmul.f32 0.5, %v437_v8  ;;  %vm331_vm9 = vweird.f32 %v1522_v3  ;;  %vm1647_vm6 = vmor %vm441_vm3, %vm442_vm4 }
  0x9d   : > { %v398_v13 = vmul.f32 0.5, %v397_v10 }
  0x9e   : > { %v318_v15 = vmul.f32 0.5, %v317_v12  ;;  %v268_v16 = vpop.xlane.xlu1 %267  ;;  %v439_v33 = vsub.f32 1.5, %v438_v14 }
  0x9f   : > { %v265_v17 = vpop.xlane.xlu0 %264  ;;  %v1536_v21 = vpop.eup %1148  ;;  %v1538_v22 = vmax.f32 %v268_v16, 1e-24  ;;  %v399_v26 = vsub.f32 1.5, %v398_v13 }
  0xa0   : > { %v1540_v23 = vmax.f32 %v265_v17, 1e-24  ;;  %v283_v24 = vpop.xlane.xlu2 %282  ;;  %v1542_v25 = vpop.eup %1150  ;;  %v446_v30 = vmul.f32 %v1536_v21, %v1514_v59  ;;  %v319_v34 = vsub.f32 1.5, %v318_v15  ;;  %v1570_v47 = vmul.f32 %v1512_v58, %v439_v33 }
  0xa1   : > { %v1546_v31 = vpop.eup %1152  ;;  %v406_v32 = vmul.f32 %v1542_v25, %v1516_v60  ;;  %1154 = vrsqrt.f32 %v1538_v22  ;;  %v400_v41 = vmul.f32 %v1518_v62, %v399_v26  ;;  %v1564_v43 = vmax.f32 %v283_v24, 1e-24 }
  0xa2   : > { %v447_v35 = vmul.f32 %v1536_v21, %v446_v30  ;;  %v326_v39 = vmul.f32 %v1546_v31, %v1522_v3  ;;  %1156 = vrsqrt.f32 %v1540_v23  ;;  %v320_v48 = vmul.f32 %v1524_v4, %v319_v34 }
  0xa3   : > { %v407_v40 = vmul.f32 %v1542_v25, %v406_v32  ;;  %1158 = vrsqrt.f32 %v1564_v43  ;;  %vm412_vm11 = vweird.f32 %v1542_v25  ;;  %vm332_vm12 = vweird.f32 %v1546_v31 }
  0xa4   : > { %v327_v42 = vmul.f32 %v1546_v31, %v326_v39  ;;  %v448_v44 = vmul.f32 0.5, %v447_v35  ;;  %v404_v52 = vsel %vm1580_vm10, %v1518_v62, %v400_v41  ;;  %vm452_vm14 = vweird.f32 %v1536_v21  ;;  %vm1610_vm15 = vmor %vm411_vm8, %vm412_vm11 }
  0xa5   : > { %v408_v46 = vmul.f32 0.5, %v407_v40  ;;  %v324_v17 = vsel %vm1601_vm13, %v1524_v4, %v320_v48  ;;  %vm1623_vm1 = vmor %vm331_vm9, %vm332_vm12  ;;  %vm371_vm2 = vweird.f32 %v1538_v22  ;;  %v483_v30 = vmul.f32 %v404_v52, %v1405_v1 }
  0xa6   : > { %v328_v49 = vmul.f32 0.5, %v327_v42  ;;  %v295_v50 = vpop.xlane.xlu1 %294  ;;  %v449_v13 = vsub.f32 1.5, %v448_v44  ;;  %vm361_vm5 = vweird.f32 %v1540_v23  ;;  %v475_v39 = vmul.f32 %v324_v17, %v1408_v2  ;;  %vm1673_vm4 = vmor %vm451_vm7, %vm452_vm14 }
  0xa7   : > { %v286_v53 = vpop.xlane.xlu0 %285  ;;  %v1574_v54 = vpop.eup %1154  ;;  %v409_v57 = vsub.f32 1.5, %v408_v46  ;;  %v1585_v61 = vmax.f32 %v295_v50, 1e-24  ;;  %v444_v51 = vsel %vm1647_vm6, %v1512_v58, %v1570_v47  ;;  %vm421_vm3 = vweird.f32 %v1564_v43 }
  0xa8   : > { %v1587_v63 = vmax.f32 %v286_v53, 1e-24  ;;  %v298_v5 = vpop.xlane.xlu2 %297  ;;  %v329_v8 = vsub.f32 1.5, %v328_v49  ;;  %v366_v9 = vmul.f32 %v1574_v54, %v1538_v22  ;;  %v1595_v10 = vpop.eup %1156  ;;  %v450_v1 = vmul.f32 %v1536_v21, %v449_v13 }
  0xa9   : > { %v410_v14 = vmul.f32 %v1542_v25, %v409_v57  ;;  %1160 = vrsqrt.f32 %v1585_v61  ;;  %v356_v16 = vmul.f32 %v1595_v10, %v1540_v23  ;;  %v1629_v60 = vmax.f32 %v298_v5, 1e-24  ;;  %v1635_v32 = vpop.eup %1158 }
  0xaa   : > { %v330_v15 = vmul.f32 %v1546_v31, %v329_v8  ;;  %v367_v55 = vmul.f32 %v1574_v54, %v366_v9  ;;  %1162 = vrsqrt.f32 %v1587_v63  ;;  %v416_v35 = vmul.f32 %v1635_v32, %v1564_v43 }
  0xab   : > { %v414_v26 = vsel %vm1610_vm15, %v1542_v25, %v410_v14  ;;  %v357_v3 = vmul.f32 %v1595_v10, %v356_v16  ;;  %1164 = vrsqrt.f32 %v1629_v60  ;;  %vm372_vm8 = vweird.f32 %v1574_v54 }
  0xac   : > { %v368_v4 = vmul.f32 0.5, %v367_v55  ;;  %v334_v33 = vsel %vm1623_vm1, %v1546_v31, %v330_v15  ;;  %v484_v34 = vmul.f32 %v414_v26, %v1420_v7  ;;  %v417_v46 = vmul.f32 %v1635_v32, %v416_v35  ;;  %vm1721_vm13 = vmor %vm371_vm2, %vm372_vm8 }
  0xad   : > { %v358_v40 = vmul.f32 0.5, %v357_v3  ;;  %v476_v2 = vmul.f32 %v334_v33, %v1426_v11  ;;  %vm461_vm9 = vweird.f32 %v1585_v61  ;;  %vm362_vm10 = vweird.f32 %v1595_v10 }
  0xae   : > { %v369_v31 = vsub.f32 1.5, %v368_v4  ;;  %v262_v7 = vpop.xlane.xlu1 %261  ;;  %v495_v42 = vpack.c.bf16 %v484_v34, %v483_v30  ;;  %v418_v59 = vmul.f32 0.5, %v417_v46  ;;  %v454_v56 = vsel %vm1673_vm4, %v1536_v21, %v450_v1  ;;  %vm1708_vm12 = vmor %vm361_vm5, %vm362_vm10 }
  0xaf   : > { %v259_v41 = vpop.xlane.xlu0 %258  ;;  %v1660_v44 = vpop.eup %1160  ;;  %v1664_v48 = vmax.f32 %v262_v7, 1e-24  ;;  %v359_v58 = vsub.f32 1.5, %v358_v40  ;;  %vm431_vm7 = vweird.f32 %v1587_v63  ;;  %v491_v14 = vpack.c.bf16 %v476_v2, %v475_v39 }
  0xb0   : > { %v1666_v49 = vmax.f32 %v259_v41, 1e-24  ;;  %v456_v47 = vmul.f32 %v1660_v44, %v1585_v61  ;;  %v271_v53 = vpop.xlane.xlu2 %270  ;;  %1050 = vmatmul.msk.bf16.vlgmr.msra.gmra.mxu2 %vm250_vm0, %v495_v42  ;;  %v1682_v11 = vpop.eup %1162  ;;  %v370_v57 = vmul.f32 %v1574_v54, %v369_v31  ;;  %v419_v12 = vsub.f32 1.5, %v418_v59 }
  0xb1   : > { %1166 = vrsqrt.f32 %v1664_v48  ;;  %v360_v5 = vmul.f32 %v1595_v10, %v359_v58  ;;  %v426_v9 = vmul.f32 %v1682_v11, %v1587_v63  ;;  %v1694_v52 = vpop.eup %1164  ;;  %v1698_v13 = vmax.f32 %v271_v53, 1e-24  ;;  %1046 = vmatmul.msk.bf16.vlgmr.msra.gmra.mxu0 %vm250_vm0, %v491_v14 }
  0xb2   : > { %v457_v8 = vmul.f32 %v1660_v44, %v456_v47  ;;  %1168 = vrsqrt.f32 %v1666_v49  ;;  %vm422_vm11 = vweird.f32 %v1635_v32  ;;  %v466_v15 = vmul.f32 %v1694_v52, %v1629_v60 }
  0xb3   : > { %v427_v62 = vmul.f32 %v1682_v11, %v426_v9  ;;  %v420_v16 = vmul.f32 %v1635_v32, %v419_v12  ;;  %1170 = vrsqrt.f32 %v1698_v13  ;;  %v487_v17 = vmul.f32 %v444_v51, %v1402_v0  ;;  %vm1746_vm1 = vmor %vm421_vm3, %vm422_vm11 }
  0xb4   : > { %v458_v21 = vmul.f32 0.5, %v457_v8  ;;  %v488_v24 = vmul.f32 %v454_v56, %v1417_v6  ;;  %v467_v4 = vmul.f32 %v1694_v52, %v466_v15  ;;  %v364_v33 = vsel %vm1708_vm12, %v1595_v10, %v360_v5 }
  0xb5   : > { %v428_v30 = vmul.f32 0.5, %v427_v62  ;;  %v374_v22 = vsel %vm1721_vm13, %v1574_v54, %v370_v57  ;;  %v479_v25 = vmul.f32 %v364_v33, %v1441_v19  ;;  %vm462_vm14 = vweird.f32 %v1660_v44 }
  0xb6   : > { %v459_v26 = vsub.f32 1.5, %v458_v21  ;;  %v497_v34 = vpack.c.bf16 %v488_v24, %v487_v17  ;;  %v468_v35 = vmul.f32 0.5, %v467_v4  ;;  %vm432_vm15 = vweird.f32 %v1682_v11  ;;  %vm1756_vm2 = vmor %vm461_vm9, %vm462_vm14 }
  0xb7   : > { %v274_v3 = vpop.xlane.xlu0 %273  ;;  %v1167_v0 = vpop.eup %1166  ;;  %v429_v1 = vsub.f32 1.5, %v428_v30  ;;  %v480_v10 = vmul.f32 %v374_v22, %v1438_v18  ;;  %vm471_vm5 = vweird.f32 %v1629_v60  ;;  %vm472_vm6 = vweird.f32 %v1694_v52  ;;  %vm433_vm3 = vmor %vm431_vm7, %vm432_vm15 }
  0xb8   : > { %v1729_v6 = vmax.f32 %v274_v3, 1e-24  ;;  %v346_v39 = vmul.f32 %v1167_v0, %v1664_v48  ;;  %v1169_v31 = vpop.eup %1168  ;;  %v460_v40 = vmul.f32 %v1660_v44, %v459_v26  ;;  %1052 = vmatmul.msk.bf16.vlgmr.msra.gmra.mxu3 %vm250_vm0, %v497_v34  ;;  %v469_v7 = vsub.f32 1.5, %v468_v35  ;;  %vm1777_vm9 = vmor %vm471_vm5, %vm472_vm6 }
  0xb9   : > { %v430_v54 = vmul.f32 %v1682_v11, %v429_v1  ;;  %v336_v42 = vmul.f32 %v1169_v31, %v1666_v49  ;;  %v1171_v51 = vpop.eup %1170  ;;  %v493_v43 = vpack.c.bf16 %v480_v10, %v479_v25  ;;  %v424_v46 = vsel %vm1746_vm1, %v1635_v32, %v420_v16 }
  0xba   : > { %1172 = vrsqrt.f32 %v1729_v6  ;;  %v347_v41 = vmul.f32 %v1167_v0, %v346_v39  ;;  %v470_v61 = vmul.f32 %v1694_v52, %v469_v7  ;;  %v376_v58 = vmul.f32 %v1171_v51, %v1698_v13 }
  0xbb   : > { %v337_v50 = vmul.f32 %v1169_v31, %v336_v42  ;;  %vm351_vm4 = vweird.f32 %v1664_v48  ;;  %vm352_vm8 = vweird.f32 %v1167_v0  ;;  %1048 = vmatmul.msk.bf16.vlgmr.msra.gmra.mxu1 %vm250_vm0, %v493_v43  ;;  %v434_v60 = vsel %vm433_vm3, %v1682_v11, %v430_v54 }
  0xbc   : > { %v348_v2 = vmul.f32 0.5, %v347_v41  ;;  %v464_v32 = vsel %vm1756_vm2, %v1660_v44, %v460_v40  ;;  %v377_v59 = vmul.f32 %v1171_v51, %v376_v58  ;;  %v486_v56 = vmul.f32 %v434_v60, %v1459_v28  ;;  %vm353_vm7 = vmor %vm351_vm4, %vm352_vm8 }
  0xbd   : > { %v338_v53 = vmul.f32 0.5, %v337_v50  ;;  %vm342_vm10 = vweird.f32 %v1169_v31  ;;  %v485_v5 = vmul.f32 %v424_v46, %v1444_v20  ;;  %v474_v11 = vsel %vm1777_vm9, %v1694_v52, %v470_v61 }
  0xbe   : > { %v349_v47 = vsub.f32 1.5, %v348_v2  ;;  %v378_v44 = vmul.f32 0.5, %v377_v59  ;;  %vm341_vm11 = vweird.f32 %v1666_v49  ;;  %v489_v14 = vmul.f32 %v464_v32, %v1456_v27 }
  0xbf   : > { %v339_v9 = vsub.f32 1.5, %v338_v53  ;;  %v496_v28 = vpack.c.bf16 %v486_v56, %v485_v5  ;;  %v490_v20 = vmul.f32 %v474_v11, %v1462_v29  ;;  %vm343_vm12 = vmor %vm341_vm11, %vm342_vm10  ;;  %vm381_vm13 = vweird.f32 %v1698_v13 }
  0xc0   : > { %v1173_v57 = vpop.eup %1172  ;;  %v350_v8 = vmul.f32 %v1167_v0, %v349_v47  ;;  %v379_v62 = vsub.f32 1.5, %v378_v44  ;;  %vm382_vm14 = vweird.f32 %v1171_v51  ;;  %vm391_vm2 = vweird.f32 %v1729_v6 }
  0xc1   : > { %v386_v12 = vmul.f32 %v1173_v57, %v1729_v6  ;;  %v340_v21 = vmul.f32 %v1169_v31, %v339_v9  ;;  %1051 = vmatmul.msk.bf16.gmra.mxu2 %vm250_vm0, %v496_v28  ;;  %v498_v17 = vpack.c.bf16 %v490_v20, %v489_v14  ;;  %vm392_vm15 = vweird.f32 %v1173_v57  ;;  %vm383_vm1 = vmor %vm381_vm13, %vm382_vm14 }
  0xc2   : > { %v354_v52 = vsel %vm353_vm7, %v1167_v0, %v350_v8  ;;  %v380_v55 = vmul.f32 %v1171_v51, %v379_v62  ;;  %vm393_vm5 = vmor %vm391_vm2, %vm392_vm15 }
  0xc3   : > { %v387_v15 = vmul.f32 %v1173_v57, %v386_v12  ;;  %v478_v48 = vmul.f32 %v354_v52, %v1474_v36  ;;  %v344_v16 = vsel %vm343_vm12, %v1169_v31, %v340_v21 }
  0xc4   : > { %v477_v27 = vmul.f32 %v344_v16, %v1477_v37  ;;  %v384_v26 = vsel %vm383_vm1, %v1171_v51, %v380_v55  ;;  %v1807_v37 = vld [vmem:[%s2077_s2] ss:$0 sm:$0xff] }
  0xc5   : > { %v388_v49 = vmul.f32 0.5, %v387_v15  ;;  %v481_v13 = vmul.f32 %v384_v26, %v1480_v38 }
  0xc6   : > { %v492_v24 = vpack.c.bf16 %v478_v48, %v477_v27 }
  0xc7   : > { %v389_v29 = vsub.f32 1.5, %v388_v49 }
  0xc8   : > { %1053 = vmatmul.msk.bf16.gmra.mxu3 %vm250_vm0, %v498_v17  ;;  %1047 = vmatmul.msk.bf16.gmra.mxu0 %vm250_vm0, %v492_v24 }
  0xc9   : > { %v390_v23 = vmul.f32 %v1173_v57, %v389_v29 }
  0xcb   : > { %v394_v36 = vsel %vm393_vm5, %v1173_v57, %v390_v23 }
  0xcc   : > { %v482_v30 = vmul.f32 %v394_v36, %v1492_v45 }
  0xce   : > { %v494_v4 = vpack.c.bf16 %v482_v30, %v481_v13 }
  0xd0   : > { %1049 = vmatmul.msk.bf16.gmra.mxu1 %vm250_vm0, %v494_v4 }
 0x12e   : > { %v552_v3 = vpop.f32.mrf.mxu0 }
 0x12f   : > { %v553_v33 = vadd.f32 %v1807_v37, %v552_v3 }
 0x131   : > { %v1054_v6 = vmul.f32 -1.442695, %v553_v33 }
 0x133   : > { %v572_v0 = vpop.f32.mrf.mxu2  ;;  %1174 = vpow2.f32 %v1054_v6 }
 0x134   : > { %v573_v34 = vadd.f32 %v1807_v37, %v572_v0 }
 0x136   : > { %v1062_v22 = vmul.f32 -1.442695, %v573_v34  ;;  %v554_v38 = vpop.f32.mrf.mxu0 }
 0x137   : > { %v555_v25 = vadd.f32 %v1807_v37, %v554_v38 }
 0x138   : > { %1176 = vpow2.f32 %v1062_v22  ;;  %v562_v45 = vpop.f32.mrf.mxu1 }
 0x139   : > { %v563_v1 = vadd.f32 %v1807_v37, %v562_v45  ;;  %v1175_v31 = vpop.eup %1174  ;;  %v1055_v10 = vmul.f32 -1.442695, %v555_v25 }
 0x13a   : > { %v640_v54 = vadd.f32 1.0, %v1175_v31 }
 0x13b   : > { %v574_v35 = vpop.f32.mrf.mxu2  ;;  %v582_v39 = vpop.f32.mrf.mxu3  ;;  %1178 = vpow2.f32 %v1055_v10  ;;  %v1058_v51 = vmul.f32 -1.442695, %v563_v1 }
 0x13c   : > { %v583_v40 = vadd.f32 %v1807_v37, %v582_v39  ;;  %v575_v7 = vadd.f32 %v1807_v37, %v574_v35  ;;  %1180 = vrcp.f32 %v640_v54  ;;  %v665_v50 = vand.u32 2147483647, %v640_v54 }
 0x13d   : > { %v667_v63 = vand.u32 2147483648, %v640_v54  ;;  %vm661_vm0 = vweird.f32 %v640_v54 }
 0x13e   : > { %v1177_v19 = vpop.eup %1176  ;;  %v1066_v42 = vmul.f32 -1.442695, %v583_v40  ;;  %v1063_v18 = vmul.f32 -1.442695, %v575_v7  ;;  %vm1828_vm3 = vcmp.eq.f32.partialorder %v665_v50, 8.507059e+37 }
 0x13f   : > { %v1815_v41 = vadd.f32 1.0, %v1177_v19  ;;  %v668_v14 = vor.u32 1.1754944e-38, %v667_v63 }
 0x140   : > { %v564_v43 = vpop.f32.mrf.mxu1 }
 0x141   : > { %1182 = vrcp.f32 %v1815_v41  ;;  %v565_v46 = vadd.f32 %v1807_v37, %v564_v43  ;;  %v1179_v2 = vpop.eup %1178  ;;  %vm781_vm6 = vweird.f32 %v1815_v41  ;;  %v785_v11 = vand.u32 2147483647, %v1815_v41 }
 0x142   : > { %1184 = vpow2.f32 %v1066_v42  ;;  %v1181_v32 = vpop.eup %1180  ;;  %v1820_v47 = vadd.f32 1.0, %v1179_v2  ;;  %v787_v8 = vand.u32 2147483648, %v1815_v41 }
 0x143   : > { %1186 = vpow2.f32 %v1058_v51  ;;  %v584_v61 = vpop.f32.mrf.mxu3  ;;  %v1059_v60 = vmul.f32 -1.442695, %v565_v46  ;;  %v657_v59 = vmul.f32 %v1181_v32, %v640_v54  ;;  %vm662_vm4 = vweird.f32 %v1181_v32 }
 0x144   : > { %v585_v58 = vadd.f32 %v1807_v37, %v584_v61  ;;  %1188 = vpow2.f32 %v1063_v18  ;;  %v680_v15 = vand.u32 2147483647, %v1820_v47  ;;  %v577_v52 = vpop.f32.mrf.mxu2  ;;  %vm1842_vm9 = vcmp.eq.f32.partialorder %v785_v11, 8.507059e+37  ;;  %vm663_vm7 = vmor %vm661_vm0, %vm662_vm4 }
 0x145   : > { %1190 = vrcp.f32 %v1820_v47  ;;  %v658_v44 = vsub.f32 1.0, %v657_v59  ;;  %v788_v16 = vor.u32 1.1754944e-38, %v787_v8  ;;  %vm676_vm10 = vweird.f32 %v1820_v47  ;;  %v557_v19 = vpop.f32.mrf.mxu0 }
 0x146   : > { %v1067_v56 = vmul.f32 -1.442695, %v585_v58  ;;  %1192 = vpow2.f32 %v1059_v60  ;;  %v682_v27 = vand.u32 2147483648, %v1820_v47  ;;  %v578_v36 = vadd.f32 %v1807_v37, %v577_v52 }
 0x147   : > { %v1183_v53 = vpop.eup %1182  ;;  %v659_v62 = vmul.f32 %v1181_v32, %v658_v44  ;;  %vm1857_vm12 = vcmp.eq.f32.partialorder %v680_v15, 8.507059e+37  ;;  %v558_v52 = vadd.f32 %v1807_v37, %v557_v19 }
 0x148   : > { %v1185_v57 = vpop.eup %1184  ;;  %v777_v5 = vmul.f32 %v1183_v53, %v1815_v41  ;;  %1194 = vpow2.f32 %v1067_v56  ;;  %vm782_vm8 = vweird.f32 %v1183_v53  ;;  %v683_v35 = vor.u32 1.1754944e-38, %v682_v27 }
 0x149   : > { %v1187_v9 = vpop.eup %1186  ;;  %v1832_v28 = vadd.f32 1.0, %v1185_v57  ;;  %v660_v17 = vadd.f32 %v1181_v32, %v659_v62  ;;  %vm783_vm11 = vmor %vm781_vm6, %vm782_vm8 }
 0x14a   : > { %v778_v20 = vsub.f32 1.0, %v777_v5  ;;  %v1834_v21 = vadd.f32 1.0, %v1187_v9  ;;  %v1189_v48 = vpop.eup %1188 }
 0x14b   : > { %1196 = vrcp.f32 %v1832_v28  ;;  %v1191_v29 = vpop.eup %1190  ;;  %v845_v23 = vand.u32 2147483647, %v1832_v28  ;;  %v847_v26 = vand.u32 2147483648, %v1832_v28  ;;  %v664_v30 = vsel %vm663_vm7, %v1181_v32, %v660_v17  ;;  %v587_v10 = vpop.f32.mrf.mxu3 }
 0x14c   : > { %v779_v55 = vmul.f32 %v1183_v53, %v778_v20  ;;  %1198 = vrcp.f32 %v1834_v21  ;;  %v1193_v13 = vpop.eup %1192  ;;  %v672_v4 = vmul.f32 %v1191_v29, %v1820_v47  ;;  %v1861_v33 = vadd.f32 1.0, %v1189_v48  ;;  %v579_v48 = vpop.f32.mrf.mxu2 }
 0x14d   : > { %v669_v34 = vsel %vm1828_vm3, %v668_v14, %v664_v30  ;;  %vm841_vm13 = vweird.f32 %v1832_v28  ;;  %v725_v22 = vand.u32 2147483647, %v1834_v21  ;;  %v727_v38 = vand.u32 2147483648, %v1834_v21  ;;  %v559_v27 = vpop.f32.mrf.mxu0 }
 0x14e   : > { %v780_v24 = vadd.f32 %v1183_v53, %v779_v55  ;;  %v1195_v0 = vpop.eup %1194  ;;  %896 = vst [vmem:[%s1869_s18] sm:$0xff] %v669_v34  ;;  %v673_v1 = vsub.f32 1.0, %v672_v4  ;;  %1200 = vrcp.f32 %v1861_v33  ;;  %vm1877_vm14 = vcmp.eq.f32.partialorder %v845_v23, 8.507059e+37  ;;  %v567_v4 = vpop.f32.mrf.mxu1 }
 0x14f   : > { %v848_v40 = vor.u32 1.1754944e-38, %v847_v26  ;;  %vm721_vm15 = vweird.f32 %v1834_v21  ;;  %vm677_vm1 = vweird.f32 %v1191_v29  ;;  %v1882_v41 = vadd.f32 1.0, %v1195_v0 }
 0x150   : > { %v784_v6 = vsel %vm783_vm11, %v1183_v53, %v780_v24  ;;  %v674_v7 = vmul.f32 %v1191_v29, %v673_v1  ;;  %v1884_v42 = vadd.f32 1.0, %v1193_v13  ;;  %vm1887_vm2 = vcmp.eq.f32.partialorder %v725_v22, 8.507059e+37  ;;  %vm678_vm0 = vmor %vm676_vm10, %vm677_vm1 }
 0x151   : > { %v1197_v45 = vpop.eup %1196  ;;  %v789_v25 = vsel %vm1842_vm9, %v788_v16, %v784_v6  ;;  %v728_v46 = vor.u32 1.1754944e-38, %v727_v38  ;;  %v800_v2 = vand.u32 2147483647, %v1861_v33  ;;  %v802_v50 = vand.u32 2147483648, %v1861_v33 }
 0x152   : > { %904 = vst [vmem:[%s1869_s18 + $0x40] sm:$0xff] %v789_v25  ;;  %v837_v39 = vmul.f32 %v1197_v45, %v1832_v28  ;;  %v1199_v54 = vpop.eup %1198  ;;  %v675_v61 = vadd.f32 %v1191_v29, %v674_v7  ;;  %1202 = vrcp.f32 %v1882_v41  ;;  %vm842_vm5 = vweird.f32 %v1197_v45 }
 0x153   : > { %v717_v18 = vmul.f32 %v1199_v54, %v1834_v21  ;;  %vm796_vm6 = vweird.f32 %v1861_v33  ;;  %vm722_vm3 = vweird.f32 %v1199_v54  ;;  %1204 = vrcp.f32 %v1884_v42  ;;  %vm843_vm4 = vmor %vm841_vm13, %vm842_vm5  ;;  %v589_v17 = vpop.f32.mrf.mxu3 }
 0x154   : > { %v838_v51 = vsub.f32 1.0, %v837_v39  ;;  %v1201_v32 = vpop.eup %1200  ;;  %v679_v63 = vsel %vm678_vm0, %v1191_v29, %v675_v61  ;;  %v1064_v53 = vmul.f32 -1.442695, %v578_v36  ;;  %vm1904_vm8 = vcmp.eq.f32.partialorder %v800_v2, 8.507059e+37  ;;  %vm723_vm10 = vmor %vm721_vm15, %vm722_vm3 }
 0x155   : > { %v718_v60 = vsub.f32 1.0, %v717_v18  ;;  %v684_v56 = vsel %vm1857_vm12, %v683_v35, %v679_v63  ;;  %v792_v5 = vmul.f32 %v1201_v32, %v1861_v33  ;;  %v803_v11 = vor.u32 1.1754944e-38, %v802_v50 }
 0x156   : > { %v839_v58 = vmul.f32 %v1197_v45, %v838_v51  ;;  %897 = vst [vmem:[%s1869_s18 + $0x8] sm:$0xff] %v684_v56  ;;  %v860_v8 = vand.u32 2147483647, %v1882_v41  ;;  %v862_v9 = vand.u32 2147483648, %v1882_v41  ;;  %vm856_vm9 = vweird.f32 %v1882_v41 }
 0x157   : > { %v719_v57 = vmul.f32 %v1199_v54, %v718_v60  ;;  %v793_v14 = vsub.f32 1.0, %v792_v5  ;;  %v740_v20 = vand.u32 2147483647, %v1884_v42  ;;  %1206 = vpow2.f32 %v1064_v53  ;;  %v569_v60 = vpop.f32.mrf.mxu1 }
 0x158   : > { %v840_v59 = vadd.f32 %v1197_v45, %v839_v58  ;;  %v1203_v28 = vpop.eup %1202  ;;  %v588_v15 = vadd.f32 %v1807_v37, %v587_v10  ;;  %vm797_vm7 = vweird.f32 %v1201_v32  ;;  %v742_v24 = vand.u32 2147483648, %v1884_v42 }
 0x159   : > { %v720_v12 = vadd.f32 %v1199_v54, %v719_v57  ;;  %v794_v49 = vmul.f32 %v1201_v32, %v793_v14  ;;  %v852_v16 = vmul.f32 %v1203_v28, %v1882_v41  ;;  %v1205_v29 = vpop.eup %1204  ;;  %v1056_v26 = vmul.f32 -1.442695, %v558_v52  ;;  %vm798_vm12 = vmor %vm796_vm6, %vm797_vm7 }
 0x15a   : > { %v844_v44 = vsel %vm843_vm4, %v1197_v45, %v840_v59  ;;  %v1068_v23 = vmul.f32 -1.442695, %v588_v15  ;;  %vm857_vm11 = vweird.f32 %v1203_v28  ;;  %v732_v30 = vmul.f32 %v1205_v29, %v1884_v42 }
 0x15b   : > { %v849_v62 = vsel %vm1877_vm14, %v848_v40, %v844_v44  ;;  %v724_v55 = vsel %vm723_vm10, %v1199_v54, %v720_v12  ;;  %v795_v36 = vadd.f32 %v1201_v32, %v794_v49  ;;  %v853_v13 = vsub.f32 1.0, %v852_v16  ;;  %vm858_vm14 = vmor %vm856_vm9, %vm857_vm11 }
 0x15c   : > { %908 = vst [vmem:[%s1869_s18 + $0x60] sm:$0xff] %v849_v62  ;;  %v729_v21 = vsel %vm1887_vm2, %v728_v46, %v724_v55  ;;  %1208 = vpow2.f32 %v1068_v23  ;;  %v580_v3 = vadd.f32 %v1807_v37, %v579_v48  ;;  %v590_v0 = vadd.f32 %v1807_v37, %v589_v17 }
 0x15d   : > { %900 = vst [vmem:[%s1869_s18 + $0x20] sm:$0xff] %v729_v21  ;;  %v560_v34 = vadd.f32 %v1807_v37, %v559_v27  ;;  %v799_v6 = vsel %vm798_vm12, %v1201_v32, %v795_v36  ;;  %v854_v22 = vmul.f32 %v1203_v28, %v853_v13  ;;  %v733_v38 = vsub.f32 1.0, %v732_v30  ;;  %v1207_v45 = vpop.eup %1206 }
 0x15e   : > { %1210 = vpow2.f32 %v1056_v26  ;;  %v804_v25 = vsel %vm1904_vm8, %v803_v11, %v799_v6  ;;  %vm737_vm13 = vweird.f32 %v1205_v29  ;;  %v1065_v1 = vmul.f32 -1.442695, %v580_v3 }
 0x15f   : > { %v1069_v35 = vmul.f32 -1.442695, %v590_v0  ;;  %905 = vst [vmem:[%s1869_s18 + $0x48] sm:$0xff] %v804_v25  ;;  %v855_v33 = vadd.f32 %v1203_v28, %v854_v22  ;;  %v734_v39 = vmul.f32 %v1205_v29, %v733_v38  ;;  %v1935_v31 = vadd.f32 1.0, %v1207_v45 }
 0x160   : > { %v1057_v40 = vmul.f32 -1.442695, %v560_v34  ;;  %v863_v10 = vor.u32 1.1754944e-38, %v862_v9  ;;  %vm736_vm15 = vweird.f32 %v1884_v42  ;;  %1212 = vpow2.f32 %v1065_v1 }
 0x161   : > { %v568_v19 = vadd.f32 %v1807_v37, %v567_v4  ;;  %v859_v54 = vsel %vm858_vm14, %v1203_v28, %v855_v33  ;;  %vm861_vm1 = vcmp.eq.f32.partialorder %v860_v8, 8.507059e+37  ;;  %v735_v7 = vadd.f32 %v1205_v29, %v734_v39  ;;  %vm738_vm2 = vmor %vm736_vm15, %vm737_vm13 }
 0x162   : > { %1214 = vrcp.f32 %v1935_v31  ;;  %v1209_v51 = vpop.eup %1208  ;;  %v864_v18 = vsel %vm861_vm1, %v863_v10, %v859_v54  ;;  %v743_v43 = vor.u32 1.1754944e-38, %v742_v24  ;;  %vm741_vm5 = vcmp.eq.f32.partialorder %v740_v20, 8.507059e+37 }
 0x163   : > { %1216 = vpow2.f32 %v1069_v35  ;;  %909 = vst [vmem:[%s1869_s18 + $0x68] sm:$0xff] %v864_v18  ;;  %v739_v46 = vsel %vm738_vm2, %v1205_v29, %v735_v7  ;;  %v1947_v61 = vadd.f32 1.0, %v1209_v51  ;;  %v1060_v58 = vmul.f32 -1.442695, %v568_v19 }
 0x164   : > { %v1211_v41 = vpop.eup %1210  ;;  %1218 = vpow2.f32 %v1057_v40  ;;  %v744_v2 = vsel %vm741_vm5, %v743_v43, %v739_v46  ;;  %v815_v53 = vand.u32 2147483647, %v1935_v31  ;;  %v817_v42 = vand.u32 2147483648, %v1935_v31 }
 0x165   : > { %v1949_v50 = vadd.f32 1.0, %v1211_v41  ;;  %901 = vst [vmem:[%s1869_s18 + $0x28] sm:$0xff] %v744_v2  ;;  %1220 = vrcp.f32 %v1947_v61  ;;  %v570_v5 = vadd.f32 %v1807_v37, %v569_v60  ;;  %vm811_vm0 = vweird.f32 %v1935_v31 }
 0x166   : > { %v1213_v32 = vpop.eup %1212  ;;  %v875_v11 = vand.u32 2147483647, %v1947_v61  ;;  %v877_v8 = vand.u32 2147483648, %v1947_v61  ;;  %vm1969_vm6 = vcmp.eq.f32.partialorder %v815_v53, 8.507059e+37  ;;  %v818_v37 = vor.u32 1.1754944e-38, %v817_v42 }
 0x167   : > { %1222 = vrcp.f32 %v1949_v50  ;;  %v1956_v59 = vadd.f32 1.0, %v1213_v32  ;;  %v695_v44 = vand.u32 2147483647, %v1949_v50  ;;  %vm871_vm3 = vweird.f32 %v1947_v61 }
 0x168   : > { %v1215_v63 = vpop.eup %1214  ;;  %1224 = vpow2.f32 %v1060_v58  ;;  %v697_v62 = vand.u32 2147483648, %v1949_v50  ;;  %vm1977_vm8 = vcmp.eq.f32.partialorder %v875_v11, 8.507059e+37  ;;  %v878_v49 = vor.u32 1.1754944e-38, %v877_v8 }
 0x169   : > { %v1217_v56 = vpop.eup %1216  ;;  %v807_v57 = vmul.f32 %v1215_v63, %v1935_v31  ;;  %1226 = vrcp.f32 %v1956_v59  ;;  %vm812_vm4 = vweird.f32 %v1215_v63  ;;  %vm691_vm9 = vweird.f32 %v1949_v50 }
 0x16a   : > { %v1219_v47 = vpop.eup %1218  ;;  %v1965_v12 = vadd.f32 1.0, %v1217_v56  ;;  %vm1983_vm10 = vcmp.eq.f32.partialorder %v695_v44, 8.507059e+37  ;;  %vm813_vm7 = vmor %vm811_vm0, %vm812_vm4  ;;  %v698_v26 = vor.u32 1.1754944e-38, %v697_v62  ;;  %v830_v36 = vand.u32 2147483647, %v1956_v59 }
 0x16b   : > { %v808_v9 = vsub.f32 1.0, %v807_v57  ;;  %v1967_v14 = vadd.f32 1.0, %v1219_v47  ;;  %v1221_v20 = vpop.eup %1220  ;;  %v1061_v13 = vmul.f32 -1.442695, %v570_v5  ;;  %vm826_vm13 = vweird.f32 %v1956_v59 }
 0x16c   : > { %v867_v48 = vmul.f32 %v1221_v20, %v1947_v61  ;;  %1228 = vrcp.f32 %v1965_v12  ;;  %vm872_vm11 = vweird.f32 %v1221_v20  ;;  %v832_v45 = vand.u32 2147483648, %v1956_v59 }
 0x16d   : > { %v1223_v15 = vpop.eup %1222  ;;  %v809_v52 = vmul.f32 %v1215_v63, %v808_v9  ;;  %1230 = vrcp.f32 %v1967_v14  ;;  %vm873_vm14 = vmor %vm871_vm3, %vm872_vm11  ;;  %vm2001_vm15 = vcmp.eq.f32.partialorder %v830_v36, 8.507059e+37  ;;  %v890_v43 = vand.u32 2147483647, %v1965_v12 }
 0x16e   : > { %v687_v16 = vmul.f32 %v1223_v15, %v1949_v50  ;;  %v1225_v17 = vpop.eup %1224  ;;  %v868_v29 = vsub.f32 1.0, %v867_v48  ;;  %vm692_vm12 = vweird.f32 %v1223_v15  ;;  %1232 = vpow2.f32 %v1061_v13 }
 0x16f   : > { %v810_v27 = vadd.f32 %v1215_v63, %v809_v52  ;;  %v1227_v24 = vpop.eup %1226  ;;  %v1997_v25 = vadd.f32 1.0, %v1225_v17  ;;  %vm693_vm1 = vmor %vm691_vm9, %vm692_vm12  ;;  %v892_v41 = vand.u32 2147483648, %v1965_v12  ;;  %v833_v46 = vor.u32 1.1754944e-38, %v832_v45 }
 0x170   : > { %v688_v23 = vsub.f32 1.0, %v687_v16  ;;  %v869_v4 = vmul.f32 %v1221_v20, %v868_v29  ;;  %v822_v3 = vmul.f32 %v1227_v24, %v1956_v59  ;;  %vm827_vm2 = vweird.f32 %v1227_v24 }
 0x171   : > { %v814_v30 = vsel %vm813_vm7, %v1215_v63, %v810_v27  ;;  %1234 = vrcp.f32 %v1997_v25  ;;  %vm828_vm5 = vmor %vm826_vm13, %vm827_vm2  ;;  %v710_v58 = vand.u32 2147483647, %v1967_v14  ;;  %v712_v60 = vand.u32 2147483648, %v1967_v14 }
 0x172   : > { %v819_v0 = vsel %vm1969_vm6, %v818_v37, %v814_v30  ;;  %v689_v34 = vmul.f32 %v1223_v15, %v688_v23  ;;  %v1229_v6 = vpop.eup %1228  ;;  %v870_v22 = vadd.f32 %v1221_v20, %v869_v4  ;;  %v823_v38 = vsub.f32 1.0, %v822_v3 }
 0x173   : > { %906 = vst [vmem:[%s1869_s18 + $0x50] sm:$0xff] %v819_v0  ;;  %v882_v33 = vmul.f32 %v1229_v6, %v1965_v12  ;;  %v1231_v39 = vpop.eup %1230  ;;  %vm887_vm0 = vweird.f32 %v1229_v6  ;;  %vm886_vm6 = vweird.f32 %v1965_v12  ;;  %v893_v56 = vor.u32 1.1754944e-38, %v892_v41 }
 0x174   : > { %v690_v1 = vadd.f32 %v1223_v15, %v689_v34  ;;  %v874_v31 = vsel %vm873_vm14, %v1221_v20, %v870_v22  ;;  %v824_v40 = vmul.f32 %v1227_v24, %v823_v38  ;;  %v702_v7 = vmul.f32 %v1231_v39, %v1967_v14  ;;  %v1233_v32 = vpop.eup %1232  ;;  %vm888_vm4 = vmor %vm886_vm6, %vm887_vm0 }
 0x175   : > { %v879_v10 = vsel %vm1977_vm8, %v878_v49, %v874_v31  ;;  %v883_v54 = vsub.f32 1.0, %v882_v33  ;;  %vm707_vm3 = vweird.f32 %v1231_v39  ;;  %vm891_vm8 = vcmp.eq.f32.partialorder %v890_v43, 8.507059e+37 }
 0x176   : > { %v694_v19 = vsel %vm693_vm1, %v1223_v15, %v690_v1  ;;  %910 = vst [vmem:[%s1869_s18 + $0x70] sm:$0xff] %v879_v10  ;;  %v825_v18 = vadd.f32 %v1227_v24, %v824_v40  ;;  %v703_v2 = vsub.f32 1.0, %v702_v7  ;;  %v647_v57 = vadd.f32 1.0, %v1233_v32 }
 0x177   : > { %v699_v51 = vsel %vm1983_vm10, %v698_v26, %v694_v19  ;;  %v884_v61 = vmul.f32 %v1229_v6, %v883_v54  ;;  %v1235_v59 = vpop.eup %1234  ;;  %vm706_vm9 = vweird.f32 %v1967_v14  ;;  %v713_v9 = vor.u32 1.1754944e-38, %v712_v60 }
 0x178   : > { %898 = vst [vmem:[%s1869_s18 + $0x10] sm:$0xff] %v699_v51  ;;  %v829_v50 = vsel %vm828_vm5, %v1227_v24, %v825_v18  ;;  %v704_v42 = vmul.f32 %v1231_v39, %v703_v2  ;;  %v747_v11 = vmul.f32 %v1235_v59, %v1997_v25  ;;  %vm708_vm10 = vmor %vm706_vm9, %vm707_vm3  ;;  %1236 = vrcp.f32 %v647_v57 }
 0x179   : > { %v834_v63 = vsel %vm2001_vm15, %v833_v46, %v829_v50  ;;  %v885_v53 = vadd.f32 %v1229_v6, %v884_v61  ;;  %vm711_vm7 = vcmp.eq.f32.partialorder %v710_v58, 8.507059e+37  ;;  %v757_v28 = vand.u32 2147483648, %v1997_v25 }
 0x17a   : > { %907 = vst [vmem:[%s1869_s18 + $0x58] sm:$0xff] %v834_v63  ;;  %v705_v47 = vadd.f32 %v1231_v39, %v704_v42  ;;  %v748_v12 = vsub.f32 1.0, %v747_v11  ;;  %vm752_vm11 = vweird.f32 %v1235_v59  ;;  %v755_v14 = vand.u32 2147483647, %v1997_v25 }
 0x17b   : > { %v889_v5 = vsel %vm888_vm4, %v1229_v6, %v885_v53  ;;  %vm751_vm12 = vweird.f32 %v1997_v25  ;;  %v758_v52 = vor.u32 1.1754944e-38, %v757_v28  ;;  %v772_v17 = vand.u32 2147483648, %v647_v57 }
 0x17c   : > { %v894_v8 = vsel %vm891_vm8, %v893_v56, %v889_v5  ;;  %v709_v44 = vsel %vm708_vm10, %v1231_v39, %v705_v47  ;;  %v749_v37 = vmul.f32 %v1235_v59, %v748_v12  ;;  %vm753_vm13 = vmor %vm751_vm12, %vm752_vm11  ;;  %vm756_vm14 = vcmp.eq.f32.partialorder %v755_v14, 8.507059e+37 }
 0x17d   : > { %911 = vst [vmem:[%s1869_s18 + $0x78] sm:$0xff] %v894_v8  ;;  %v714_v20 = vsel %vm711_vm7, %v713_v9, %v709_v44  ;;  %v770_v29 = vand.u32 2147483647, %v647_v57  ;;  %vm766_vm1 = vweird.f32 %v647_v57  ;;  %v773_v24 = vor.u32 1.1754944e-38, %v772_v17 }
 0x17e   : > { %899 = vst [vmem:[%s1869_s18 + $0x18] sm:$0xff] %v714_v20  ;;  %v750_v62 = vadd.f32 %v1235_v59, %v749_v37  ;;  %v1237_v15 = vpop.eup %1236 }
 0x17f   : > { %v762_v55 = vmul.f32 %v1237_v15, %v647_v57  ;;  %vm767_vm15 = vweird.f32 %v1237_v15  ;;  %vm771_vm5 = vcmp.eq.f32.partialorder %v770_v29, 8.507059e+37 }
 0x180   : > { %v754_v48 = vsel %vm753_vm13, %v1235_v59, %v750_v62  ;;  %vm768_vm2 = vmor %vm766_vm1, %vm767_vm15 }
 0x181   : > { %v759_v49 = vsel %vm756_vm14, %v758_v52, %v754_v48  ;;  %v763_v16 = vsub.f32 1.0, %v762_v55 }
 0x182   : > { %902 = vst [vmem:[%s1869_s18 + $0x30] sm:$0xff] %v759_v49 }
 0x183   : > { %v764_v27 = vmul.f32 %v1237_v15, %v763_v16 }
 0x185   : > { %v765_v21 = vadd.f32 %v1237_v15, %v764_v27 }
 0x187   : > { %v769_v23 = vsel %vm768_vm2, %v1237_v15, %v765_v21 }
 0x188   : > { %v774_v26 = vsel %vm771_vm5, %v773_v24, %v769_v23 }
 0x189   : > { %903 = vst [vmem:[%s1869_s18 + $0x38] sm:$0xff] %v774_v26 }
 0x18a   : > { %1265 = shalt.err (!%p1262_p5)
}
 0x18b   : > { %s1318_s9 = smov 128   ;;  %s1319_s10 = smov 8  }
 0x18c   : > { %1084 = dma.vmem_to_hbm [thread:$0]  (%p1380_p4), %s927_s27, 2048, %s929_s28, %s913_s15, %s1318_s9, %s1318_s9, %s1319_s10  }
 0x18d PF: > { %p1090_p6 = scmp.ge.s32.totalorder %s1316_s17, 2  ;;  %s943_s11 = sand.u32 1, %s1296_s12  }
 0x18e   : > { %s944_s18 = scalar_lea.sflag [#allocation3], %s943_s11 }
 0x18f   : > { %p1087_p7 = pnand %p1090_p6, %p1387_p8 }
 0x191   : > { %p1088_p9 = pneg %p1087_p7 }
 0x193   : > { %1291 = dma.done.wait (%p1088_p9), %s944_s18, 2048  }
 0x194   : > { %1293 = vsyncadd (%p1088_p9), %s944_s18, 4294965248  ;;  %s16_s17 = sadd.s32 1, %s1316_s17   ;;  %s2123_s12 = smov %s1300_s13 }
 0x195   : > { %p13_p10 = scmp.ge.s32.totalorder %s16_s17, 4   ;;  %s2124_s13 = smov %s1304_s14 }
 0x196   : > { %s2125_s14 = smov %s1393_s25  ;;  %s2126_s15 = smov %s1312_s16 }
 0x197   : > { %s2127_s16 = smov %s2129_s20  ;;  %15 = sbr.rel (!%p13_p10) target bundleno = 4 (0x4), region = 73 }
 0x19c   :  { %950 = vsyncpa [#allocation3], 1 }
 0x19d   :  { %952 = vsyncpa [#allocation3 + $0x1], 1 }

</bundles_post_ra>
